<compile_context>
chip_gen: v7x
topology: tpu7x:2x2x1
jax: 0.10.0
libtpu: 0.0.40
codegen_flags: <defaults>
</compile_context>

<pallas_src>
import jax
import jax.numpy as jnp
from jax.experimental import pallas as pl
from jax.experimental.pallas import tpu as pltpu


# --------------------------------------------------------------------------- #
# Pallas kernel: fused SA/NA masked-NLL partial sums for the phrase head.
# --------------------------------------------------------------------------- #
def _phrase_nll_kernel(sa_ref, na_ref, lab_ref, sa_acc_ref, na_acc_ref):
    # Output blocks are per-parallel-core resident accumulators across the
    # inner ("arbitrary") row-tile axis: init once per core on its first step.
    @pl.when(pl.program_id(1) == 0)
    def _():
        sa_acc_ref[...] = jnp.zeros_like(sa_acc_ref)
        na_acc_ref[...] = jnp.zeros_like(na_acc_ref)

    rows, vocab = sa_ref.shape
    lab = lab_ref[...]                                           # (rows, 1) i32
    # One shared label-match mask for both streams (hoisted compare).
    match = jax.lax.broadcasted_iota(jnp.int32, (rows, vocab), 1) == lab

    # Select in the native log-prob dtype (no full-tile f32 upcast); rows with
    # label -1 (masked / padded) never match and contribute exactly 0.
    sa_pick = jnp.where(match, sa_ref[...], jnp.zeros((), sa_ref.dtype))
    na_pick = jnp.where(match, na_ref[...], jnp.zeros((), na_ref.dtype))

    # VPU-only accumulation: fold the (rows//8) sublane groups onto the (8, V)
    # accumulator; f32 accumulation, no per-step cross-lane (XLU) reduce.
    sa_acc_ref[...] += jnp.sum(sa_pick.reshape(rows // 8, 8, vocab), axis=0,
                               dtype=jnp.float32)
    na_acc_ref[...] += jnp.sum(na_pick.reshape(rows // 8, 8, vocab), axis=0,
                               dtype=jnp.float32)


# --------------------------------------------------------------------------- #
# Tiling helpers.
# --------------------------------------------------------------------------- #
def _detect_parallel_cores():
    """2 TensorCores on v7x-class chips, 1 elsewhere (safe fallback: 1)."""
    try:
        kind = jax.devices()[0].device_kind.lower()
    except Exception:
        return 1
    return 2 if ("v7" in kind or "tpu7" in kind) else 1


def _choose_rows_tile(n_rows, vocab, itemsize):
    """Rows per grid step.

    Target ~6 MiB per log-prob block (2 streams x 2 pipeline buffers ~= 24 MiB
    of streaming VMEM, under the explicit 40 MiB scoped limit -> fits v7x's
    64 MiB physical VMEM and is comfortable on v5e/v6e).  Rounded to the
    dtype's sublane packing (8 rows f32, 16 bf16, 32 int8/fp8) and capped so
    the lane-padded (rt, 1) label block stays <= ~2 MiB.
    """
    sub = 8 * max(1, 4 // max(1, itemsize))
    block_budget = 6 * 1024 * 1024
    rows_budget = max(sub, block_budget // max(1, vocab * itemsize))
    rows_budget = min(rows_budget, 4096)          # (rt,1) labels pad to 128 lanes
    rt = min(rows_budget, max(n_rows, sub))
    return max(sub, (rt // sub) * sub)


# --------------------------------------------------------------------------- #
# Wrapper (forward pass, reduction='mean', self_dis=False).
# --------------------------------------------------------------------------- #
def language_model_criterion_uic(SA_len_lp, SA_syn_lp, SA_ph_lp,
                                 NA_len_lp, NA_syn_lp, NA_ph_lp,
                                 phrase_num, phrase_length_label,
                                 phrase_syn_label, phrase_label):
    # TODO(synk): reduction='none' and self_dis=True (KLDivLoss) branches of the
    # PyTorch module are not implemented; only the default mean-reduction path.
    if phrase_length_label.ndim == 3:
        phrase_num = phrase_num.reshape(-1)
        phrase_length_label = phrase_length_label.reshape(
            -1, phrase_length_label.shape[2])
        phrase_syn_label = phrase_syn_label.reshape(-1, phrase_syn_label.shape[2])
        phrase_label = phrase_label.reshape(-1, phrase_label.shape[2])

    # --- masks / labels (tiny XLA glue; masks folded into labels) ------------
    real_phrase_label = phrase_label[:, 1:-1].astype(jnp.int32)     # (B, T-2)
    Tm2 = real_phrase_label.shape[1]
    tok_thresh = jnp.sum(phrase_length_label, axis=1) - 1           # (B,)
    phrase_mask = jnp.arange(Tm2)[None, :] < tok_thresh[:, None]    # bool
    # NOTE: matches the reference — if sum(phrase_mask) == 0 the losses are inf.
    mask_sum = jnp.sum(phrase_mask.astype(jnp.float32))

    real_len_label = phrase_length_label[:, 1:].astype(jnp.int32)   # (B, Lp)
    real_syn_label = phrase_syn_label[:, 1:].astype(jnp.int32)      # (B, Lp)
    Lp = real_len_label.shape[1]
    label_mask = (jnp.arange(Lp)[None, :] < phrase_num[:, None]).astype(jnp.float32)

    # --- tiny V=16 length / syn heads: plain XLA (per perf review; not worth
    #     holding lane-padded constant blocks in VMEM across the whole grid) ---
    def _small_head_sum(lp, lab):
        g = jnp.take_along_axis(lp, lab[..., None], axis=-1)[..., 0]
        return jnp.sum(-g.astype(jnp.float32) * label_mask)

    sa_len_sum = _small_head_sum(SA_len_lp, real_len_label)
    na_len_sum = _small_head_sum(NA_len_lp, real_len_label)
    sa_syn_sum = _small_head_sum(SA_syn_lp, real_syn_label)
    na_syn_sum = _small_head_sum(NA_syn_lp, real_syn_label)

    # --- big word-vocab phrase heads: fused Pallas masked-NLL reduction ------
    # TODO(synk): for very large word vocabs, a scalar-prefetch DMA gather of
    # only the 128-lane slab containing each label would cut HBM traffic ~V/128x.
    Vw = SA_ph_lp.shape[-1]
    sa_ph2 = SA_ph_lp.reshape(-1, Vw)
    na_ph2 = NA_ph_lp.reshape(-1, Vw)
    R = sa_ph2.shape[0]                               # B * (T-2)
    itemsize = jnp.dtype(sa_ph2.dtype).itemsize

    # Masked rows get label -1 (never matches the vocab iota).
    ph_lab = jnp.where(phrase_mask, real_phrase_label, -1).reshape(-1, 1)

    rt = _choose_rows_tile(R, Vw, itemsize)
    num_blocks = pl.cdiv(R, rt)
    P = max(1, min(_detect_parallel_cores(), num_blocks))   # parallel shards
    Tp = pl.cdiv(num_blocks, P)                              # tiles per shard
    r_pad = P * Tp * rt
    # Pad labels only (tiny); the big log-prob tensors are never copied.
    ph_lab = jnp.pad(ph_lab, ((0, r_pad - R), (0, 0)), constant_values=-1)

    last_blk = num_blocks - 1

    def lp_index_map(p, t):
        # Clamp fully out-of-range tiles back to the last valid block; their
        # rows carry label -1 so they contribute exactly 0.  Partially
        # out-of-bounds edge rows are likewise neutralized by label -1.
        return (jnp.minimum(p * Tp + t, last_blk), 0)

    def lab_index_map(p, t):
        return (p * Tp + t, 0)        # labels padded to r_pad -> always in bounds

    acc_shape = jax.ShapeDtypeStruct((8 * P, Vw), jnp.float32)
    cost = pl.CostEstimate(
        flops=4 * R * Vw,
        transcendentals=0,
        bytes_accessed=2 * R * Vw * itemsize + r_pad * 4 + 2 * 8 * P * Vw * 4)

    sa_acc, na_acc = pl.pallas_call(
        _phrase_nll_kernel,
        out_shape=(acc_shape, acc_shape),
        grid_spec=pltpu.PrefetchScalarGridSpec(
            num_scalar_prefetch=0,
            grid=(P, Tp),
            in_specs=[
                pl.BlockSpec((rt, Vw), lp_index_map),   # SA phrase log-probs
                pl.BlockSpec((rt, Vw), lp_index_map),   # NA phrase log-probs
                pl.BlockSpec((rt, 1), lab_index_map),   # labels (+mask folded in)
            ],
            out_specs=(
                pl.BlockSpec((8, Vw), lambda p, t: (p, 0)),  # SA per-core acc
                pl.BlockSpec((8, Vw), lambda p, t: (p, 0)),  # NA per-core acc
            ),
        ),
        compiler_params=pltpu.CompilerParams(
            dimension_semantics=("parallel", "arbitrary"),
            vmem_limit_bytes=40 * 1024 * 1024),
        cost_estimate=cost,
    )(sa_ph2, na_ph2, ph_lab)

    # Single cheap cross-lane/sublane collapse in the epilogue (+ negation).
    sa_ph_sum = -jnp.sum(sa_acc)
    na_ph_sum = -jnp.sum(na_acc)

    SA_length_loss_mean = sa_len_sum / mask_sum
    SA_phrase_loss_mean = sa_ph_sum / mask_sum
    SA_syn_loss_mean = sa_syn_sum / mask_sum
    NA_length_loss_mean = na_len_sum / mask_sum
    NA_phrase_loss_mean = na_ph_sum / mask_sum
    NA_syn_loss_mean = na_syn_sum / mask_sum
    output = (SA_length_loss_mean + SA_phrase_loss_mean + SA_syn_loss_mean +
              NA_length_loss_mean + NA_phrase_loss_mean + NA_syn_loss_mean)
    return (output, SA_length_loss_mean, SA_phrase_loss_mean, SA_syn_loss_mean,
            NA_length_loss_mean, NA_phrase_loss_mean, NA_syn_loss_mean)


# --------------------------------------------------------------------------- #
# Pure-JAX reference (mirrors the PyTorch forward, mean reduction).
# --------------------------------------------------------------------------- #
def _reference(SA_len_lp, SA_syn_lp, SA_ph_lp, NA_len_lp, NA_syn_lp, NA_ph_lp,
               phrase_num, phrase_length_label, phrase_syn_label, phrase_label):
    real_ph = phrase_label[:, 1:-1]
    Tm2 = real_ph.shape[1]
    thr = jnp.sum(phrase_length_label, axis=1) - 1
    pm = (jnp.arange(Tm2)[None, :] < thr[:, None]).astype(jnp.float32)
    real_len = phrase_length_label[:, 1:]
    real_syn = phrase_syn_label[:, 1:]
    Lp = real_len.shape[1]
    plm = (jnp.arange(Lp)[None, :] < phrase_num[:, None]).astype(jnp.float32)

    def g(lp, lab):
        return jnp.take_along_axis(lp, lab[:, :, None], axis=2)[:, :, 0]

    ms = jnp.sum(pm)
    sa_ph = jnp.sum(-g(SA_ph_lp, real_ph) * pm) / ms
    na_ph = jnp.sum(-g(NA_ph_lp, real_ph) * pm) / ms
    sa_len = jnp.sum(-g(SA_len_lp, real_len) * plm) / ms
    na_len = jnp.sum(-g(NA_len_lp, real_len) * plm) / ms
    sa_syn = jnp.sum(-g(SA_syn_lp, real_syn) * plm) / ms
    na_syn = jnp.sum(-g(NA_syn_lp, real_syn) * plm) / ms
    out = sa_len + sa_ph + sa_syn + na_len + na_ph + na_syn
    return (out, sa_len, sa_ph, sa_syn, na_len, na_ph, na_syn)


if __name__ == "__main__":
    key = jax.random.PRNGKey(0)
    B = 2            # batch of (image, caption) rows
    T = 12           # phrase_label length  -> real token dim = T - 2 = 10
    Lp = 4           # max phrases          -> phrase_length_label has Lp+1 = 5
    V_word, V_len, V_syn = 64, 16, 16

    ks = jax.random.split(key, 8)
    SA_ph_lp = jax.nn.log_softmax(
        jax.random.normal(ks[0], (B, T - 2, V_word), jnp.float32), axis=-1)
    NA_ph_lp = jax.nn.log_softmax(
        jax.random.normal(ks[1], (B, T - 2, V_word), jnp.float32), axis=-1)
    SA_len_lp = jax.nn.log_softmax(
        jax.random.normal(ks[2], (B, Lp, V_len), jnp.float32), axis=-1)
    NA_len_lp = jax.nn.log_softmax(
        jax.random.normal(ks[3], (B, Lp, V_len), jnp.float32), axis=-1)
    SA_syn_lp = jax.nn.log_softmax(
        jax.random.normal(ks[4], (B, Lp, V_syn), jnp.float32), axis=-1)
    NA_syn_lp = jax.nn.log_softmax(
        jax.random.normal(ks[5], (B, Lp, V_syn), jnp.float32), axis=-1)

    phrase_label = jax.random.randint(ks[6], (B, T), 0, V_word, jnp.int32)
    phrase_syn_label = jax.random.randint(ks[7], (B, Lp + 1), 0, V_syn, jnp.int32)
    # phrase lengths must be valid gather indices into V_len and their row-sum
    # must fit inside the token dim (sum - 1 <= T - 2)
    phrase_length_label = jnp.array([[0, 3, 2, 2, 1],
                                     [0, 2, 3, 1, 0]], dtype=jnp.int32)
    phrase_num = jnp.array([4, 3], dtype=jnp.int32)

    args = (SA_len_lp, SA_syn_lp, SA_ph_lp, NA_len_lp, NA_syn_lp, NA_ph_lp,
            phrase_num, phrase_length_label, phrase_syn_label, phrase_label)

    fn = jax.jit(language_model_criterion_uic)
    out = fn(*args)
    out = jax.block_until_ready(out)
    ref = _reference(*args)

    for o, r in zip(out, ref):
        assert jnp.allclose(o, r, atol=1e-5, rtol=1e-5), (o, r)

    print("KERNEL_OK")
</pallas_src>

<mosaic_0001>
module attributes {stable_mosaic.version = 11 : i64} {
  func.func @_phrase_nll_kernel(%arg0: i32, %arg1: i32, %arg2: memref<16x64xf32, #tpu.memory_space<vmem>>, %arg3: memref<16x64xf32, #tpu.memory_space<vmem>>, %arg4: memref<16x1xi32, #tpu.memory_space<vmem>>, %arg5: memref<8x64xf32, #tpu.memory_space<vmem>>, %arg6: memref<8x64xf32, #tpu.memory_space<vmem>>) attributes {dimension_semantics = [#tpu.dimension_semantics<parallel>, #tpu.dimension_semantics<arbitrary>], iteration_bounds = array<i64: 1, 2>, scalar_prefetch = 0 : i64, scratch_operands = 0 : i64, tpu.core_type = #tpu.core_type<tc>, window_params = [{transform_indices = @transform_0, window_bounds = array<i64: 16, 64>}, {transform_indices = @transform_1, window_bounds = array<i64: 16, 64>}, {transform_indices = @transform_2, window_bounds = array<i64: 16, 1>}, {transform_indices = @transform_3, window_bounds = array<i64: 8, 64>}, {transform_indices = @transform_4, window_bounds = array<i64: 8, 64>}]} {
    %c0_i32 = arith.constant 0 : i32
    %0 = arith.cmpi eq, %arg1, %c0_i32 : i32
    %1 = arith.extui %0 : i1 to i32
    %c0_i32_0 = arith.constant 0 : i32
    %2 = arith.cmpi ne, %1, %c0_i32_0 : i32
    scf.if %2 {
      %cst_17 = arith.constant 0.000000e+00 : f32
      %23 = vector.broadcast %cst_17 : f32 to vector<8x64xf32>
      %c0_18 = arith.constant 0 : index
      %c0_19 = arith.constant 0 : index
      %24 = vector.load %arg5[%c0_18, %c0_19] : memref<8x64xf32, #tpu.memory_space<vmem>>, vector<8x64xf32>
      tpu.vector_store %arg5[%c0_18, %c0_19], %23 {strides = array<i32>} : memref<8x64xf32, #tpu.memory_space<vmem>>, vector<8x64xf32>,
      %cst_20 = arith.constant 0.000000e+00 : f32
      %25 = vector.broadcast %cst_20 : f32 to vector<8x64xf32>
      %c0_21 = arith.constant 0 : index
      %c0_22 = arith.constant 0 : index
      %26 = vector.load %arg6[%c0_21, %c0_22] : memref<8x64xf32, #tpu.memory_space<vmem>>, vector<8x64xf32>
      tpu.vector_store %arg6[%c0_21, %c0_22], %25 {strides = array<i32>} : memref<8x64xf32, #tpu.memory_space<vmem>>, vector<8x64xf32>,
    } else {
    }
    %c0 = arith.constant 0 : index
    %c0_1 = arith.constant 0 : index
    %3 = vector.load %arg4[%c0, %c0_1] : memref<16x1xi32, #tpu.memory_space<vmem>>, vector<16x1xi32>
    %4 = tpu.iota {dimensions = array<i32: 1>} : vector<16x64xi32>
    %5 = vector.broadcast %3 : vector<16x1xi32> to vector<16x64xi32>
    %6 = arith.cmpi eq, %4, %5 : vector<16x64xi32>
    %c0_2 = arith.constant 0 : index
    %c0_3 = arith.constant 0 : index
    %7 = vector.load %arg2[%c0_2, %c0_3] : memref<16x64xf32, #tpu.memory_space<vmem>>, vector<16x64xf32>
    %cst = arith.constant 0.000000e+00 : f32
    %8 = vector.broadcast %cst : f32 to vector<16x64xf32>
    %9 = arith.select %6, %7, %8 : vector<16x64xi1>, vector<16x64xf32>
    %c0_4 = arith.constant 0 : index
    %c0_5 = arith.constant 0 : index
    %10 = vector.load %arg3[%c0_4, %c0_5] : memref<16x64xf32, #tpu.memory_space<vmem>>, vector<16x64xf32>
    %cst_6 = arith.constant 0.000000e+00 : f32
    %11 = vector.broadcast %cst_6 : f32 to vector<16x64xf32>
    %12 = arith.select %6, %10, %11 : vector<16x64xi1>, vector<16x64xf32>
    %c0_7 = arith.constant 0 : index
    %c0_8 = arith.constant 0 : index
    %13 = vector.load %arg5[%c0_7, %c0_8] : memref<8x64xf32, #tpu.memory_space<vmem>>, vector<8x64xf32>
    %14 = vector.shape_cast %9 : vector<16x64xf32> to vector<2x8x64xf32>
    %cst_9 = arith.constant dense<0.000000e+00> : vector<8x64xf32>
    %15 = vector.multi_reduction <add>, %14, %cst_9 [0] : vector<2x8x64xf32> to vector<8x64xf32>
    %16 = arith.addf %13, %15 : vector<8x64xf32>
    %c0_10 = arith.constant 0 : index
    %c0_11 = arith.constant 0 : index
    %17 = vector.load %arg5[%c0_10, %c0_11] : memref<8x64xf32, #tpu.memory_space<vmem>>, vector<8x64xf32>
    tpu.vector_store %arg5[%c0_10, %c0_11], %16 {strides = array<i32>} : memref<8x64xf32, #tpu.memory_space<vmem>>, vector<8x64xf32>,
    %c0_12 = arith.constant 0 : index
    %c0_13 = arith.constant 0 : index
    %18 = vector.load %arg6[%c0_12, %c0_13] : memref<8x64xf32, #tpu.memory_space<vmem>>, vector<8x64xf32>
    %19 = vector.shape_cast %12 : vector<16x64xf32> to vector<2x8x64xf32>
    %cst_14 = arith.constant dense<0.000000e+00> : vector<8x64xf32>
    %20 = vector.multi_reduction <add>, %19, %cst_14 [0] : vector<2x8x64xf32> to vector<8x64xf32>
    %21 = arith.addf %18, %20 : vector<8x64xf32>
    %c0_15 = arith.constant 0 : index
    %c0_16 = arith.constant 0 : index
    %22 = vector.load %arg6[%c0_15, %c0_16] : memref<8x64xf32, #tpu.memory_space<vmem>>, vector<8x64xf32>
    tpu.vector_store %arg6[%c0_15, %c0_16], %21 {strides = array<i32>} : memref<8x64xf32, #tpu.memory_space<vmem>>, vector<8x64xf32>,
    return
  }
  func.func @transform_0(%arg0: i32, %arg1: i32) -> (i32, i32) {
    %c2_i32 = arith.constant 2 : i32
    %0 = arith.muli %arg0, %c2_i32 : i32
    %1 = arith.addi %0, %arg1 : i32
    %c1_i32 = arith.constant 1 : i32
    %2 = arith.minsi %1, %c1_i32 : i32
    %c0_i32 = arith.constant 0 : i32
    %c0_i32_0 = arith.constant 0 : i32
    return %2, %c0_i32 : i32, i32
  }
  func.func @transform_1(%arg0: i32, %arg1: i32) -> (i32, i32) {
    %c2_i32 = arith.constant 2 : i32
    %0 = arith.muli %arg0, %c2_i32 : i32
    %1 = arith.addi %0, %arg1 : i32
    %c1_i32 = arith.constant 1 : i32
    %2 = arith.minsi %1, %c1_i32 : i32
    %c0_i32 = arith.constant 0 : i32
    %c0_i32_0 = arith.constant 0 : i32
    return %2, %c0_i32 : i32, i32
  }
  func.func @transform_2(%arg0: i32, %arg1: i32) -> (i32, i32) {
    %c2_i32 = arith.constant 2 : i32
    %0 = arith.muli %arg0, %c2_i32 : i32
    %1 = arith.addi %0, %arg1 : i32
    %c0_i32 = arith.constant 0 : i32
    %c0_i32_0 = arith.constant 0 : i32
    return %1, %c0_i32 : i32, i32
  }
  func.func @transform_3(%arg0: i32, %arg1: i32) -> (i32, i32) {
    %c0_i32 = arith.constant 0 : i32
    %c0_i32_0 = arith.constant 0 : i32
    return %arg0, %c0_i32 : i32, i32
  }
  func.func @transform_4(%arg0: i32, %arg1: i32) -> (i32, i32) {
    %c0_i32 = arith.constant 0 : i32
    %c0_i32_0 = arith.constant 0 : i32
    return %arg0, %c0_i32 : i32, i32
  }
}

</mosaic_0001>

<bundles_post_ra>
// kernel: language_model_criterion_uic.1
= control target key start
LH: loop header
LB: loop body
LE: loop exit
PB: predicated region body
PF: predicated region fallthrough
CT: control target
= control target key end

     0   :  { %s619_s15 = smov 0   ;;  %s621_s16 = smov 0   ;;  %s679_s0 = inlined_call_operand.vmem [shape: f32[20,64], index: 0, kind: input, shape index: {}]   ;;  %s680_s1 = inlined_call_operand.vmem [shape: f32[20,64], index: 1, kind: input, shape index: {}]   ;;  %s681_s2 = inlined_call_operand.vmem [shape: s32[32,1], index: 2, kind: input, shape index: {}]   ;;  %s682_s3 = inlined_call_operand.vmem [shape: f32[8,64], index: 3, kind: output, shape index: {0}]   ;;  %s683_s4 = inlined_call_operand.vmem [shape: f32[8,64], index: 4, kind: output, shape index: {1}]  }
   0x1   :  { %s623_s17 = smov 0  }
   0x2 LB: > { %s24_s18 = sadd.s32 1, %s586_s16  ;;  %p529_p0 = scmp.ge.s32.totalorder %s590_s17, 1  ;;  %s590_s17 = sphi %s623_s17, %s15_s17   ;;  %s586_s16 = sphi %s621_s16, %s685_s16   ;;  %s582_s15 = sphi %s619_s15, %s684_s15  }
   0x3   : > { %p25_p1 = scmp.ge.s32.totalorder %s24_s18, 2  ;;  %p256_p2 = scmp.lt.s32.totalorder %s590_s17, 3 }
   0x5   : > { %s687_s18 = smov (%p25_p1, %s24_s18), 0  ;;  %p257_p3 = pnand %p529_p0, %p256_p2 }
   0x6   : > { %p315_p4 = scmp.lt.s32.totalorder (!%p257_p3), %s582_s15, 1  ;;  %s534_s19 = sshll.u32 (!%p257_p3), %s582_s15, 1 }
   0x7   : > { %260 = sbr.rel (%p257_p3) target bundleno = 164 (0xa4), region = 32  ;;  %p360_p5 = scmp.lt.s32.totalorder (!%p257_p3), %s534_s19, 3 }
   0x8   : > { %p536_p7 = scmp.ne.s32.totalorder (!%p257_p3), %s582_s15, 0 }
   0xe   : > { %s316_s20 = scalar_select %p315_p4, %s582_s15, 1 }
   0xf   : > { %s689_s19 = smov (!%p360_p5, %s534_s19), 3  ;;  %378 = sbr.rel (%p536_p7) target bundleno = 22 (0x16), region = 36 }
  0x10   : > { %s530_s21 = sshll.u32 %s316_s20, 1  ;;  %s535_s22 = sshll.u32 %s689_s19, 3  ;;  %vm379_vm0 = vcmask (!%p536_p7), 523264   ;;  %v592_v0 = vmov (!%p536_p7), 0.0  }
  0x11   : > { %p322_p6 = scmp.lt.s32.totalorder %s530_s21, 2  ;;  %s363_s25 = scalar_lea.vmem %s681_s2, %s535_s22  ;;  %380 = vst.msk [vmem:[%s682_s3] sm:$0xff] (!%p536_p7), %vm379_vm0, %v592_v0  ;;  %381 = vst.msk [vmem:[%s683_s4] sm:$0xff] (!%p536_p7), %vm379_vm0, %v592_v0 }
  0x13   : > { %s691_s21 = smov (!%p322_p6, %s530_s21), 2 }
  0x14   : > { %s531_s26 = sshll.u32 %s691_s21, 3 }
  0x15   : > { %s325_s29 = scalar_lea.vmem %s679_s0, %s531_s26  ;;  %s347_s6 = scalar_lea.vmem %s680_s1, %s531_s26 }
  0x16 PF: > { %v382_v1 = vld [vmem:[%s363_s25] sm:$0xff]  ;;  %v593_v2 = vmov 0   ;;  %v383_v3 = vld [vmem:[%s363_s25 + $0x8] sm:$0xff]  ;;  %v384_v4 = vlaneseq  ;;  %vm403_vm2 = vcmask 523264  }
  0x17   : > { %567 = vset.pattern.permute.xlu0 %v593_v2  ;;  %v394_v7 = vld [vmem:[%s325_s29] sm:$0xff]  ;;  %v395_v9 = vld [vmem:[%s325_s29 + $0x8] sm:$0xff] }
  0x18   : > { %387 = vperm.xlu0 %567, %v382_v1   ;;  %v385_v5 = vand.u32 127, %v384_v4  ;;  %v398_v8 = vld [vmem:[%s347_s6] sm:$0xff]  ;;  %v399_v10 = vld [vmem:[%s347_s6 + $0x8] sm:$0xff] }
  0x19   : > { %v402_v18 = vld [vmem:[%s682_s3] sm:$0xff] }
  0x1a   : > { %v409_v19 = vld [vmem:[%s683_s4] sm:$0xff] }
  0x1c   : > { %390 = vperm.xlu0 %567, %v383_v3  }
  0x97   : > { %v388_v6 = vpop.permute.xlu0 %387 }
  0x98   : > { %vm392_vm1 = vcmp.eq.s32.totalorder %v385_v5, %v388_v6 }
  0x99   : > { %v396_v11 = vsel %vm392_vm1, %v394_v7, 0.0  ;;  %v400_v12 = vsel %vm392_vm1, %v398_v8, 0.0 }
  0x9a   : > { %v404_v16 = vsel %vm403_vm2, %v396_v11, 0.0  ;;  %v410_v17 = vsel %vm403_vm2, %v400_v12, 0.0 }
  0x9b   : > { %v391_v13 = vpop.permute.xlu0 %390 }
  0x9c   : > { %vm393_vm3 = vcmp.eq.s32.totalorder %v385_v5, %v391_v13 }
  0x9d   : > { %v397_v14 = vsel %vm393_vm3, %v395_v9, 0.0  ;;  %v401_v15 = vsel %vm393_vm3, %v399_v10, 0.0 }
  0x9e   : > { %v405_v20 = vsel %vm403_vm2, %v397_v14, 0.0  ;;  %v411_v21 = vsel %vm403_vm2, %v401_v15, 0.0 }
  0x9f   : > { %v406_v22 = vadd.f32 %v405_v20, %v404_v16  ;;  %v412_v23 = vadd.f32 %v411_v21, %v410_v17 }
  0xa1   : > { %v407_v24 = vadd.f32 %v406_v22, %v402_v18  ;;  %v413_v25 = vadd.f32 %v412_v23, %v409_v19 }
  0xa3   : > { %408 = vst.msk [vmem:[%s682_s3] sm:$0xff] %vm403_vm2, %v407_v24  ;;  %414 = vst.msk [vmem:[%s683_s4] sm:$0xff] %vm403_vm2, %v413_v25 }
  0xa4 PF: > { %s15_s17 = sadd.s32 1, %s590_s17   ;;  %s684_s15 = smov %s586_s16 }
  0xa5   : > { %p12_p8 = scmp.ge.s32.totalorder %s15_s17, 4   ;;  %s685_s16 = smov %s687_s18 }
  0xa7   :  { %14 = sbr.rel (!%p12_p8) target bundleno = 2 (0x2), region = 84 }

</bundles_post_ra>
